<compile_context>
chip_gen: v7x
topology: tpu7x:2x2x1
jax: 0.10.0
libtpu: 0.0.40
codegen_flags: <defaults>
</compile_context>

<pallas_src>
import jax
import jax.numpy as jnp
from jax import lax
from jax.experimental import pallas as pl
from jax.experimental.pallas import tpu as pltpu

_NEG_INF = float(jnp.finfo(jnp.float32).min)


# ----------------------------------------------------------------------------
# Kernel 1: embedding row gather (table stays in HBM, ids scalar-prefetched)
# ----------------------------------------------------------------------------
def _embed_gather_kernel(ids_ref, tbl_ref, hid_ref, sem):
    # ids_ref : SMEM (N,)  int32   scalar-prefetched, clamped token ids
    # tbl_ref : HBM  (V, D)        embedding table (never copied wholesale)
    # hid_ref : VMEM (TB, D)       output block for this tile of tokens
    # sem     : DMA semaphores (TB,)
    tb, _ = hid_ref.shape
    base = pl.program_id(0) * tb

    # Issue all row DMAs for this tile (overlapped), then drain.
    @pl.loop(0, tb)
    def _issue(t):
        row = ids_ref[base + t]
        pltpu.make_async_copy(
            tbl_ref.at[pl.ds(row, 1), :],
            hid_ref.at[pl.ds(t, 1), :],
            sem.at[t],
        ).start()

    @pl.loop(0, tb)
    def _drain(t):
        # wait only needs dst shape + semaphore; src index is irrelevant here
        pltpu.make_async_copy(
            tbl_ref.at[pl.ds(0, 1), :],
            hid_ref.at[pl.ds(t, 1), :],
            sem.at[t],
        ).wait()


# ----------------------------------------------------------------------------
# Kernel 2: decoder attention mask (causal + expanded padding), tiled (b, q, k)
# ----------------------------------------------------------------------------
def _decoder_mask_kernel(am_ref, mask_ref):
    # am_ref   : VMEM (B, TK) f32   padding mask slice, 1.0 = attend, 0.0 = pad
    # mask_ref : VMEM (1, 1, TQ, TK) f32 output block
    _, _, tq, tk = mask_ref.shape
    b = pl.program_id(0)
    q0 = pl.program_id(1) * tq
    k0 = pl.program_id(2) * tk

    row = q0 + lax.broadcasted_iota(jnp.int32, (tq, tk), 0)
    col = k0 + lax.broadcasted_iota(jnp.int32, (tq, tk), 1)
    causal = jnp.where(col <= row, 0.0, _NEG_INF)          # (TQ, TK) f32

    am = am_ref[pl.ds(b, 1), :]                            # (1, TK) f32
    pad = (1.0 - am) * _NEG_INF                            # 0 attend / min padded

    mask_ref[...] = pad[:, None, None, :] + causal[None, None, :, :]


# ----------------------------------------------------------------------------
# Wrapper
# ----------------------------------------------------------------------------
def _pick_tile(n, preferred):
    for cand in (preferred, 1024, 512, 256, 128, 64, 32, 16, 8):
        if cand <= n and n % cand == 0:
            return cand
    return n


def llama_pipe_embedding(input_ids, embed_table, attention_mask=None,
                         *, token_tile=256, q_tile=256, k_tile=1024):
    """Equivalent of LlamawithPipeEmbedding.forward with past_key_values=None,
    position_ids=None, inputs_embeds=None."""
    B, S = input_ids.shape
    V, D = embed_table.shape
    N = B * S

    # Clamp ids so the DMA gather can never read outside the table.
    ids = jnp.clip(input_ids.astype(jnp.int32), 0, V - 1).reshape(N)

    if attention_mask is None:
        am = jnp.ones((B, S), dtype=jnp.float32)
    else:
        am = attention_mask.astype(jnp.float32)

    # ---- embedding gather -------------------------------------------------
    tb = _pick_tile(N, token_tile)
    hid_flat = pl.pallas_call(
        _embed_gather_kernel,
        out_shape=jax.ShapeDtypeStruct((N, D), embed_table.dtype),
        grid_spec=pltpu.PrefetchScalarGridSpec(
            num_scalar_prefetch=1,
            grid=(N // tb,),
            in_specs=[pl.BlockSpec(memory_space=pl.ANY)],           # table in HBM
            out_specs=pl.BlockSpec((tb, D), lambda i, ids: (i, 0)),
            scratch_shapes=[pltpu.SemaphoreType.DMA((tb,))],
        ),
        compiler_params=pltpu.CompilerParams(
            dimension_semantics=("parallel",),
            vmem_limit_bytes=32 * 1024 * 1024,
        ),
        cost_estimate=pl.CostEstimate(
            flops=0,
            transcendentals=0,
            bytes_accessed=2 * N * D * embed_table.dtype.itemsize + N * 4,
        ),
    )(ids, embed_table)
    hidden_states = hid_flat.reshape(B, S, D)

    # ---- decoder attention mask -------------------------------------------
    tq = _pick_tile(S, q_tile)
    tk = _pick_tile(S, k_tile)
    attn_mask_4d = pl.pallas_call(
        _decoder_mask_kernel,
        out_shape=jax.ShapeDtypeStruct((B, 1, S, S), jnp.float32),
        grid=(B, S // tq, S // tk),
        in_specs=[pl.BlockSpec((B, tk), lambda b, qi, ki: (0, ki))],
        out_specs=pl.BlockSpec((1, 1, tq, tk), lambda b, qi, ki: (b, 0, qi, ki)),
        compiler_params=pltpu.CompilerParams(
            dimension_semantics=("parallel", "parallel", "parallel"),
            vmem_limit_bytes=32 * 1024 * 1024,
        ),
        cost_estimate=pl.CostEstimate(
            flops=3 * B * S * S,
            transcendentals=0,
            bytes_accessed=B * S * S * 4 + B * S * 4,
        ),
    )(am)

    # position_ids = arange(past_len, past_len + S)[None, :]; past_len = 0
    position_ids = jnp.arange(0, S, dtype=jnp.int32)[None, :]

    return hidden_states, attn_mask_4d, position_ids


if __name__ == "__main__":
    VOCAB = 256
    D_MODEL = 128
    PAD_TOKEN_ID = 0
    B, S = 2, 8

    key = jax.random.PRNGKey(0)
    k_w, k_ids = jax.random.split(key)

    # Deterministic table; padding row zeroed (nn.Embedding padding_idx behavior).
    embed_table = jax.random.normal(k_w, (VOCAB, D_MODEL), dtype=jnp.float32) * 0.02
    embed_table = embed_table.at[PAD_TOKEN_ID].set(0.0)

    input_ids = jax.random.randint(k_ids, (B, S), 1, VOCAB, dtype=jnp.int32)
    input_ids = input_ids.at[0, -1].set(PAD_TOKEN_ID)

    attention_mask = jnp.ones((B, S), dtype=jnp.int32)
    attention_mask = attention_mask.at[0, -1].set(0)   # one padded position

    hidden, mask, pos = llama_pipe_embedding(
        input_ids, embed_table, attention_mask, token_tile=8)
    jax.block_until_ready((hidden, mask, pos))

    # ---- reference (plain JAX, mirrors the HF math) ----
    ref_hidden = jnp.take(embed_table, input_ids, axis=0)
    minv = jnp.finfo(jnp.float32).min
    causal = jnp.where(jnp.arange(S)[None, :] <= jnp.arange(S)[:, None], 0.0, minv)
    pad = (1.0 - attention_mask.astype(jnp.float32)) * minv
    ref_mask = pad[:, None, None, :] + causal[None, None, :, :]

    assert hidden.shape == (B, S, D_MODEL)
    assert mask.shape == (B, 1, S, S)
    assert pos.shape == (1, S)
    assert jnp.allclose(hidden, ref_hidden)
    assert jnp.allclose(mask, ref_mask)
    assert jnp.array_equal(pos, jnp.arange(S, dtype=jnp.int32)[None, :])

    print("KERNEL_OK")
</pallas_src>

<mosaic_0001>
module attributes {stable_mosaic.version = 11 : i64} {
  func.func @_embed_gather_kernel(%arg0: i32, %arg1: memref<16xi32, #tpu.memory_space<smem>>, %arg2: memref<256x128xf32, #tpu.memory_space<any>>, %arg3: memref<8x128xf32, #tpu.memory_space<vmem>>, %arg4: memref<8x!tpu.dma_semaphore, #tpu.memory_space<semaphore_mem>>) attributes {dimension_semantics = [#tpu.dimension_semantics<parallel>], iteration_bounds = array<i64: 2>, scalar_prefetch = 1 : i64, scratch_operands = 1 : i64, tpu.core_type = #tpu.core_type<tc>, window_params = [{}, {transform_indices = @transform_1, window_bounds = array<i64: 8, 128>}]} {
    %c8_i32 = arith.constant 8 : i32
    %0 = arith.muli %arg0, %c8_i32 : i32
    %c0_i32 = arith.constant 0 : i32
    %c8_i32_0 = arith.constant 8 : i32
    %1 = arith.addi %c0_i32, %c8_i32_0 : i32
    %c1_i32 = arith.constant 1 : i32
    scf.for %arg5 = %c0_i32 to %1 step %c1_i32  : i32 {
      %c1_i32_6 = arith.constant 1 : i32
      %3 = arith.muli %arg5, %c1_i32_6 : i32
      %c0_i32_7 = arith.constant 0 : i32
      %4 = arith.addi %c0_i32_7, %3 : i32
      %5 = arith.addi %0, %4 : i32
      %6 = arith.index_cast %5 : i32 to index
      %7 = memref.load %arg1[%6] : memref<16xi32, #tpu.memory_space<smem>>
      %c0_i32_8 = arith.constant 0 : i32
      %8 = tpu.memref_slice %arg2[%7, %c0_i32_8] : memref<256x128xf32, #tpu.memory_space<any>> -> memref<1x128xf32, #tpu.memory_space<any>>
      %c0_i32_9 = arith.constant 0 : i32
      %9 = tpu.memref_slice %arg3[%4, %c0_i32_9] : memref<8x128xf32, #tpu.memory_space<vmem>> -> memref<1x128xf32, #tpu.memory_space<vmem>>
      %10 = tpu.memref_slice %arg4[%4] : memref<8x!tpu.dma_semaphore, #tpu.memory_space<semaphore_mem>> -> memref<1x!tpu.dma_semaphore, #tpu.memory_space<semaphore_mem>>
      %11 = tpu.memref_squeeze %10 : memref<1x!tpu.dma_semaphore, #tpu.memory_space<semaphore_mem>> -> memref<!tpu.dma_semaphore, #tpu.memory_space<semaphore_mem>>
      tpu.enqueue_dma source(%8 : memref<1x128xf32, #tpu.memory_space<any>>) target(%9 : memref<1x128xf32, #tpu.memory_space<vmem>>) target_semaphore(%11 : memref<!tpu.dma_semaphore, #tpu.memory_space<semaphore_mem>>)
    }
    %c8_i32_1 = arith.constant 8 : i32
    %c0_i32_2 = arith.constant 0 : i32
    %c8_i32_3 = arith.constant 8 : i32
    %2 = arith.addi %c0_i32_2, %c8_i32_3 : i32
    %c1_i32_4 = arith.constant 1 : i32
    scf.for %arg5 = %c0_i32_2 to %2 step %c1_i32_4  : i32 {
      %c1_i32_6 = arith.constant 1 : i32
      %3 = arith.muli %arg5, %c1_i32_6 : i32
      %c0_i32_7 = arith.constant 0 : i32
      %4 = arith.addi %c0_i32_7, %3 : i32
      %c0_i32_8 = arith.constant 0 : i32
      %c0_i32_9 = arith.constant 0 : i32
      %5 = tpu.memref_slice %arg2[%c0_i32_8, %c0_i32_9] : memref<256x128xf32, #tpu.memory_space<any>> -> memref<1x128xf32, #tpu.memory_space<any>>
      %c0_i32_10 = arith.constant 0 : i32
      %6 = tpu.memref_slice %arg3[%4, %c0_i32_10] : memref<8x128xf32, #tpu.memory_space<vmem>> -> memref<1x128xf32, #tpu.memory_space<vmem>>
      %7 = tpu.memref_slice %arg4[%4] : memref<8x!tpu.dma_semaphore, #tpu.memory_space<semaphore_mem>> -> memref<1x!tpu.dma_semaphore, #tpu.memory_space<semaphore_mem>>
      %8 = tpu.memref_squeeze %7 : memref<1x!tpu.dma_semaphore, #tpu.memory_space<semaphore_mem>> -> memref<!tpu.dma_semaphore, #tpu.memory_space<semaphore_mem>>
      tpu.wait_dma2 semaphore(%8 : memref<!tpu.dma_semaphore, #tpu.memory_space<semaphore_mem>>) src(%5 : memref<1x128xf32, #tpu.memory_space<any>>) dst(%6 : memref<1x128xf32, #tpu.memory_space<vmem>>)
    }
    %c8_i32_5 = arith.constant 8 : i32
    return
  }
  func.func @transform_1(%arg0: i32, %arg1: memref<16xi32, #tpu.memory_space<smem>>) -> (i32, i32) {
    %c0_i32 = arith.constant 0 : i32
    %c0_i32_0 = arith.constant 0 : i32
    return %arg0, %c0_i32 : i32, i32
  }
}

</mosaic_0001>

<bundles_post_ra>
// kernel: tpu_custom_call.1
= control target key start
LH: loop header
LB: loop body
LE: loop exit
PB: predicated region body
PF: predicated region fallthrough
CT: control target
= control target key end

     0   :  { %s529_s0 = inlined_call_operand.hbm [shape: s32[16], index: 0, kind: input, shape index: {}]   ;;  %s530_s1 = inlined_call_operand.hbm [shape: f32[256,128], index: 1, kind: input, shape index: {}]   ;;  %s531_s2 = inlined_call_operand.hbm [shape: f32[16,128], index: 2, kind: output, shape index: {}]  }
   0x1   :  { %s279_s11 = scalar_lea.hbm %s529_s0, 16 }
   0x2   :  { %p280_p0 = scmp.ne.s32.totalorder %s529_s0, %s279_s11  ;;  %p283_p1 = scmp.lt.u32.totalorder %s279_s11, %s529_s0 }
   0x4   :  { %p285_p2 = pnand %p283_p1, %p280_p0 }
   0x6   :  { %288 = shalt.err (!%p285_p2)  }
   0x7   :  { %s389_s16 = smov [#allocation4]  }
   0x8   :  { %8 = dma.hbm_to_smem %s529_s0, 16, %s389_s16, [#allocation3] }
   0x9   :  { %361 = dma.done.wait [#allocation3], 16 }
   0xa   :  { %362 = vsyncadd [#allocation3], 4294967280 }
   0xb   :  { %10 = sfence }
   0xc   :  { %11 = vsyncpa [#allocation6], 0 }
   0xd   :  { %13 = vsyncpa [#allocation6 + $0x1], 0  ;;  %s418_s19 = smov 0   ;;  %s420_s20 = smov 0  }
   0xe   :  { %s422_s21 = smov 0  }
   0xf LB: > { %s213_s0 = sadd.s32 4294967295, %s379_s21   ;;  %s435_s22 = sadd.s32 1, %s379_s21   ;;  %s379_s21 = sphi %s422_s21, %s536_s21   ;;  %s375_s20 = sphi %s420_s20, %s535_s20   ;;  %s371_s19 = sphi %s418_s19, %s534_s19  }
  0x10   : > { %s22_s23 = ssub.s32 %s379_s21, %s435_s22  ;;  %s25_s24 = sadd.s32 1, %s375_s20 }
  0x11   : > { %p23_p3 = scmp.eq.s32.totalorder %s22_s23, 0  ;;  %p214_p4 = scmp.ne.s32.totalorder %s22_s23, 0 }
  0x12   : > { %p29_p5 = scmp.eq.s32.totalorder %s379_s21, 1  ;;  %p34_p6 = scmp.ne.s32.totalorder %s375_s20, %s371_s19 }
  0x13   : > { %s444_s25 = scalar_select %p23_p3, %s375_s20, %s25_s24  }
  0x14   : > { %p446_p7 = por %p214_p4, %p29_p5  ;;  %p35_p8 = scmp.eq.s32.totalorder %s213_s0, 1 }
  0x15   : > { %p215_p10 = scmp.ge.s32.totalorder %s379_s21, 2 }
  0x16   : > { %p450_p9 = por %p35_p8, %p34_p6  ;;  %s49_s28 = sand.u32 (!%p215_p10), 1, %s375_s20  }
  0x17   : > { %44 = sbr.rel (%p215_p10) target bundleno = 98 (0x62), region = 12  ;;  %s217_s29 = sshll.u32 (!%p215_p10), %s379_s21, 3 }
  0x18   : > { %s459_s30 = sshll.u32 (!%p215_p10), %s49_s28, 3  ;;  %s462_s4 = smov (!%p215_p10), 0  }
  0x19   : > { %s51_s3 = scalar_lea.vmem (!%p215_p10), [#allocation5], %s459_s30 }
  0x1e LB: >> { %s59_s5 = sadd.s32 %s383_s4, %s217_s29  ;;  %s63_s6 = scalar_lea.vmem %s51_s3, %s383_s4 [#allocation5]  ;;  %s383_s4 = sphi %s462_s4, %s58_s4  }
  0x1f   : >> { %s60_s7 = sld [smem:[#allocation4 + %s59_s5]]  ;;  %s72_s8 = sshll.u32 %s63_s6, 4  ;;  %s73_s8 = int_to_ptr.vmem [resolvable:$true] %s72_s8 }
  0x20   : >> { %s64_s13 = scalar_lea.sflag [#allocation2], %s383_s4  ;;  %s291_s17 = scalar_lea.hbm %s530_s1, 4096 }
  0x25   : >> { %s218_s9 = sshll.u32 %s60_s7, 4 }
  0x26   : >> { %s62_s12 = scalar_lea.hbm %s530_s1, %s218_s9 }
  0x27   : >> { %s289_s14 = scalar_lea.hbm %s62_s12, 16  ;;  %p292_p12 = scmp.lt.u32.totalorder %s62_s12, %s530_s1 }
  0x28   : >> { %p290_p11 = scmp.ne.s32.totalorder %s62_s12, %s289_s14  ;;  %p293_p13 = scmp.lt.u32.totalorder %s291_s17, %s289_s14 }
  0x29   : >> { %p295_p1 = scmp.lt.u32.totalorder %s289_s14, %s62_s12 }
  0x2a   : >> { %p294_p0 = por %p293_p13, %p292_p12 }
  0x2c   : >> { %p296_p2 = por %p295_p1, %p294_p0 }
  0x2e   : >> { %p297_p3 = pnand %p296_p2, %p290_p11 }
  0x30   : >> { %300 = shalt.err (!%p297_p3)  }
  0x31   : >> { %s301_s23 = scalar_lea.vmem %s73_s8, 16  ;;  %s390_s24 = smov [#allocation5]  }
  0x32   : >> { %p302_p4 = scmp.ne.s32.totalorder %s73_s8, %s301_s23  ;;  %s303_s5 = sshll.u32 %s390_s24, 4  ;;  %s483_s5 = int_to_ptr.vmem [resolvable:$false] %s303_s5 }
  0x33   : >> { %s305_s6 = scalar_lea.vmem %s483_s5, 256  ;;  %p306_p5 = scmp.lt.s32.totalorder %s73_s8, %s483_s5 }
  0x34   : >> { %p307_p6 = scmp.lt.s32.totalorder %s305_s6, %s301_s23 }
  0x36   : >> { %p308_p8 = por %p307_p6, %p306_p5 }
  0x38   : >> { %p309_p10 = pnand %p308_p8, %p302_p4 }
  0x3a   : >> { %312 = shalt.err (!%p309_p10)  }
  0x3b   : >> { %75 = dma.hbm_to_vmem [thread:$0]  %s62_s12, 16, %s73_s8, %s64_s13 }
  0x3c   : >> { %s58_s4 = sadd.s32 1, %s383_s4  }
  0x3d   : >> { %p55_p11 = scmp.ge.s32.totalorder %s58_s4, 8  }
  0x3e   : > { %s385_s7 = smov (%p55_p11), 0  }
  0x3f   : > { %57 = sbr.rel (!%p55_p11) target bundleno = 30 (0x1e), region = 73 }
  0x46 LB: >> { %s82_s9 = scalar_lea.sflag [#allocation2], %s387_s7  ;;  %s387_s7 = sphi %s385_s7, %s81_s7  }
  0x47   : >> { %363 = dma.done.wait %s82_s9, 16 }
  0x48   : >> { %364 = vsyncadd %s82_s9, 4294967280  ;;  %s81_s7 = sadd.s32 1, %s387_s7  }
  0x49   : >> { %p78_p12 = scmp.ge.s32.totalorder %s81_s7, 8  }
  0x4a   : > { %s220_s8 = sshll.u32 (%p78_p12), %s379_s21, 7  ;;  %s100_s11 = sshll.u32 (%p78_p12), %s51_s3, 4  ;;  %s101_s11 = int_to_ptr.vmem [resolvable:$true] %s100_s11 }
  0x4b   : > { %80 = sbr.rel (!%p78_p12) target bundleno = 70 (0x46), region = 84  ;;  %s98_s29 = scalar_lea.hbm (%p78_p12), %s531_s2, %s220_s8 }
  0x4c   : > { %s87_s12 = scalar_lea.sflag (%p78_p12), [#allocation6], %s49_s28  ;;  %s313_s13 = scalar_lea.vmem (%p78_p12), %s101_s11, 128 }
  0x4d   : > { %p314_p13 = scmp.ne.s32.totalorder (%p78_p12), %s101_s11, %s313_s13  ;;  %p320_p2 = scmp.lt.s32.totalorder (%p78_p12), %s101_s11, %s483_s5 }
  0x4e   : > { %p321_p3 = scmp.lt.s32.totalorder (%p78_p12), %s305_s6, %s313_s13 }
  0x4f   : > { %p315_p0 = pnand (%p78_p12), %p314_p13, %p446_p7 }
  0x50   : > { %p322_p4 = por (%p78_p12), %p321_p3, %p320_p2 }
  0x51   : > { %p316_p1 = pneg (%p78_p12), %p315_p0 }
  0x53   : > { %p323_p5 = pnand %p322_p4, %p316_p1 }
  0x55   : > { %326 = shalt.err (!%p323_p5)
}
  0x56   : > { %s327_s14 = scalar_lea.hbm %s98_s29, 128  ;;  %s331_s28 = scalar_lea.hbm %s531_s2, 256 }
  0x57   : > { %p328_p6 = scmp.ne.s32.totalorder %s98_s29, %s327_s14  ;;  %p332_p11 = scmp.lt.u32.totalorder %s98_s29, %s531_s2 }
  0x58   : > { %p333_p12 = scmp.lt.u32.totalorder %s331_s28, %s327_s14  ;;  %p335_p0 = scmp.lt.u32.totalorder %s327_s14, %s98_s29 }
  0x59   : > { %p329_p8 = pnand %p328_p6, %p446_p7 }
  0x5a   : > { %p334_p13 = por %p333_p12, %p332_p11 }
  0x5b   : > { %p330_p10 = pneg %p329_p8 }
  0x5c   : > { %p336_p2 = por %p335_p0, %p334_p13 }
  0x5e   : > { %p337_p1 = pnand %p336_p2, %p330_p10 }
  0x60   : > { %340 = shalt.err (!%p337_p1)
}
  0x61   : > { %231 = dma.vmem_to_hbm [thread:$0]  (%p446_p7), %s101_s11, 128, %s98_s29, %s87_s12  }
  0x62 PF: > { %p237_p3 = scmp.ge.s32.totalorder %s379_s21, 1  ;;  %s112_s17 = sand.u32 1, %s371_s19  }
  0x63   : > { %s113_s18 = scalar_lea.sflag [#allocation6], %s112_s17 }
  0x64   : > { %p234_p4 = pnand %p237_p3, %p450_p9 }
  0x66   : > { %366 = dma.done.wait (!%p234_p4), %s113_s18, 128  }
  0x67   : > { %368 = vsyncadd (!%p234_p4), %s113_s18, 4294967168  ;;  %p16_p5 = scmp.ge.s32.totalorder %s435_s22, 3   ;;  %s534_s19 = smov %s375_s20 }
  0x68   : > { %s535_s20 = smov %s444_s25  ;;  %s536_s21 = smov %s435_s22 }
  0x69   :  { %18 = sbr.rel (!%p16_p5) target bundleno = 15 (0xf), region = 95 }
  0x70   :  { %118 = vsyncpa [#allocation6], 1 }
  0x71   :  { %120 = vsyncpa [#allocation6 + $0x1], 1 }
  0x72   :  { %121 = vsyncmov [#allocation2] }
  0x75   :  { %s122_s21 = vpop.sfrf %121 }
  0x76   :  { %p223_p7 = scmp.ne.s32.totalorder %s122_s21, 0 }
  0x78   :  { %126 = shalt.err (%p223_p7)  }
  0x79   :  { %128 = vsyncmov [#allocation2 + $0x1] }
  0x7c   :  { %s129_s26 = vpop.sfrf %128 }
  0x7d   :  { %p224_p9 = scmp.ne.s32.totalorder %s129_s26, 0 }
  0x7f   :  { %133 = shalt.err (%p224_p9)  }
  0x80   :  { %135 = vsyncmov [#allocation2 + $0x2] }
  0x83   :  { %s136_s27 = vpop.sfrf %135 }
  0x84   :  { %p225_p6 = scmp.ne.s32.totalorder %s136_s27, 0 }
  0x86   :  { %140 = shalt.err (%p225_p6)  }
  0x87   :  { %142 = vsyncmov [#allocation2 + $0x3] }
  0x8a   :  { %s143_s0 = vpop.sfrf %142 }
  0x8b   :  { %p226_p8 = scmp.ne.s32.totalorder %s143_s0, 0 }
  0x8d   :  { %147 = shalt.err (%p226_p8)  }
  0x8e   :  { %149 = vsyncmov [#allocation2 + $0x4] }
  0x91   :  { %s150_s22 = vpop.sfrf %149 }
  0x92   :  { %p227_p10 = scmp.ne.s32.totalorder %s150_s22, 0 }
  0x94   :  { %154 = shalt.err (%p227_p10)  }
  0x95   :  { %156 = vsyncmov [#allocation2 + $0x5] }
  0x98   :  { %s157_s1 = vpop.sfrf %156 }
  0x99   :  { %p228_p11 = scmp.ne.s32.totalorder %s157_s1, 0 }
  0x9b   :  { %161 = shalt.err (%p228_p11)  }
  0x9c   :  { %163 = vsyncmov [#allocation2 + $0x6] }
  0x9f   :  { %s164_s2 = vpop.sfrf %163 }
  0xa0   :  { %p229_p12 = scmp.ne.s32.totalorder %s164_s2, 0 }
  0xa2   :  { %168 = shalt.err (%p229_p12)  }
  0xa3   :  { %170 = vsyncmov [#allocation2 + $0x7] }
  0xa6   :  { %s171_s19 = vpop.sfrf %170 }
  0xa7   :  { %p230_p13 = scmp.ne.s32.totalorder %s171_s19, 0 }
  0xa9   :  { %175 = shalt.err (%p230_p13)  }

</bundles_post_ra>
